<compile_context>
chip_gen: v6e
topology: v6e:2x2x1
jax: 0.10.0
libtpu: 0.0.40
codegen_flags: <defaults>
</compile_context>

<pallas_src>
import functools

import jax
import jax.numpy as jnp
from jax.experimental import pallas as pl
from jax.experimental.pallas import tpu as pltpu


_FALLBACK_VMEM_BYTES = 64 * 1024 * 1024   # v7x per-TensorCore VMEM (smallest)
_DEFAULT_BLOCK_BYTES = 4 * 1024 * 1024    # mem-bound tiles saturate HBM well below this


def _vmem_capacity_bytes() -> int:
    try:
        return int(pltpu.get_tpu_info().vmem_capacity_bytes)
    except Exception:
        return _FALLBACK_VMEM_BYTES


def _two_tensorcores_per_chip() -> bool:
    # v7x has 2 TensorCores per chip (and 64 MiB VMEM per TC).
    try:
        if "v7" in jax.devices()[0].device_kind.lower():
            return True
    except Exception:
        pass
    try:
        return int(pltpu.get_tpu_info().vmem_capacity_bytes) <= (96 << 20)
    except Exception:
        return False


def _sublane_packing(dtype) -> int:
    # Sub-32-bit dtypes pack along sublanes: 8 rows for f32, 16 for bf16, 32 for int8.
    return 8 * max(1, 4 // jnp.dtype(dtype).itemsize)


def _min_identity(dtype):
    dtype = jnp.dtype(dtype)
    if jnp.issubdtype(dtype, jnp.floating):
        return jnp.array(jnp.inf, dtype)
    if jnp.issubdtype(dtype, jnp.integer):
        return jnp.array(jnp.iinfo(dtype).max, dtype)
    raise ValueError(f"unsupported dtype for min reduction: {dtype}")


# ----------------------------- kernel --------------------------------------


def _min_kernel(x_ref, o_ref, *, d1, tile_d1, ragged):
    """x_ref: (tb, tile_d1, td2) native dtype; o_ref: (tb, td2) f32 accumulator."""
    k = pl.program_id(2)
    x = x_ref[...]

    if ragged:
        # Rows past D1 in the last reduction tile hold unspecified data; mask
        # them with the min-identity so they cannot leak into the result.
        last = pl.num_programs(2) - 1
        rows = jax.lax.broadcasted_iota(jnp.int32, x.shape, 1)
        in_bounds = (k * tile_d1 + rows) < d1
        keep = jnp.logical_or(k != last, in_bounds)
        x = jnp.where(keep, x, _min_identity(x.dtype))

    # Reduce in the native dtype (exact for min), cast only the reduced row.
    tile_min = jnp.min(x, axis=1).astype(jnp.float32)

    @pl.when(k == 0)
    def _first():
        o_ref[...] = tile_min

    @pl.when(k != 0)
    def _accumulate():
        o_ref[...] = jnp.minimum(o_ref[...], tile_min)


# ----------------------------- wrapper --------------------------------------


def min_over_dim1(x: jax.Array, *, max_block_bytes: int | None = None) -> jax.Array:
    """Equivalent to torch.min(x.float(), dim=1).values for a 3-D input."""
    if x.ndim != 3:
        raise ValueError("expected a 3-D input (batch, dim1, dim2)")
    B, D1, D2 = map(int, x.shape)
    itemsize = jnp.dtype(x.dtype).itemsize
    packing = _sublane_packing(x.dtype)
    vmem_cap = _vmem_capacity_bytes()

    # Per streamed-input-buffer budget (the pipeline double-buffers it).
    budget = _DEFAULT_BLOCK_BYTES if max_block_bytes is None else int(max_block_bytes)
    budget = max(budget, packing * 128 * itemsize)

    # --- lane tile over D2: prefer fully contiguous DMA (td2 == D2) ---------
    seg_min = max(128, -(-512 // itemsize))        # keep HBM segments >= 512 B
    if B * packing * D2 * itemsize <= budget or D2 % 128 != 0:
        td2 = D2
    else:
        cands = [c for c in range(128, D2 + 1, 128) if D2 % c == 0]
        fitting = [c for c in cands if B * packing * c * itemsize <= budget]
        if fitting:
            td2 = max(fitting)
        else:
            big_enough = [c for c in cands if c >= seg_min]
            td2 = min(big_enough) if big_enough else max(cands)

    # --- batch tile: only split B when the minimal block blows the budget ---
    # (output block needs tb % 8 == 0 or tb == B)
    tb = B
    per_b = packing * td2 * itemsize
    if B * per_b > budget and B > 8:
        t = max(8, min(B, (budget // per_b) // 8 * 8))
        tb = next((c for c in range(t, 7, -8) if B % c == 0), t)
    nb = pl.cdiv(B, tb)
    nj = D2 // td2

    # --- v7x megacore: guarantee >= 2 parallel blocks to shard across TCs ---
    if _two_tensorcores_per_chip() and nb * nj < 2:
        if td2 == D2 and D2 % 256 == 0 and D2 // 2 >= seg_min:
            td2 = D2 // 2
            nj = 2
        elif tb == B and B % 16 == 0:
            tb = B // 2
            nb = 2

    # --- reduction tile over D1 from the remaining budget -------------------
    denom = tb * td2 * itemsize
    tile_d1 = max(packing, (budget // denom) // packing * packing)
    if tile_d1 >= D1:
        tile_d1 = D1
    else:
        # Prefer a tile that divides D1: removes the masked ragged tail.
        for cand in range(tile_d1, max(tile_d1 // 2, packing) - 1, -packing):
            if D1 % cand == 0:
                tile_d1 = cand
                break
    nk = pl.cdiv(D1, tile_d1)
    ragged = (D1 % tile_d1) != 0

    in_block = tb * tile_d1 * td2 * itemsize
    out_block = tb * td2 * 4
    needed = 2 * in_block + 2 * out_block + (2 << 20)
    vmem_limit = int(min(vmem_cap, max(needed, 16 << 20)))

    kernel = functools.partial(_min_kernel, d1=D1, tile_d1=tile_d1, ragged=ragged)

    return pl.pallas_call(
        kernel,
        out_shape=jax.ShapeDtypeStruct((B, D2), jnp.float32),
        grid_spec=pltpu.PrefetchScalarGridSpec(
            num_scalar_prefetch=0,
            grid=(nb, nj, nk),                    # reduction axis last
            in_specs=[pl.BlockSpec((tb, tile_d1, td2), lambda b, j, k: (b, k, j))],
            out_specs=pl.BlockSpec((tb, td2), lambda b, j, k: (b, j)),
        ),
        compiler_params=pltpu.CompilerParams(
            dimension_semantics=("parallel", "parallel", "arbitrary"),
            vmem_limit_bytes=vmem_limit,
        ),
    )(x)


if __name__ == "__main__":
    key = jax.random.PRNGKey(0)
    k1, k2, k3, k4 = jax.random.split(key, 4)

    # Case 1: small f32 input -> single (1,1,1) grid block, full dims.
    x1 = jax.random.normal(k1, (2, 20, 128), dtype=jnp.float32)
    out1 = jax.block_until_ready(min_over_dim1(x1))
    ref1 = jnp.min(x1, axis=1)
    assert out1.shape == (2, 128) and out1.dtype == jnp.float32
    assert jnp.allclose(out1, ref1), "case 1 mismatch vs reference"

    # Case 2: bf16 with a tiny forced budget -> multi-step reduction with
    # native-dtype min, in-kernel cast, and a masked ragged last tile.
    x2 = jax.random.normal(k2, (4, 300, 256), dtype=jnp.float32).astype(jnp.bfloat16)
    out2 = jax.block_until_ready(min_over_dim1(x2, max_block_bytes=8 * 1024))
    ref2 = jnp.min(x2, axis=1).astype(jnp.float32)
    assert out2.shape == (4, 256) and out2.dtype == jnp.float32
    assert jnp.allclose(out2, ref2), "case 2 mismatch vs reference"

    # Case 3: D2 not a multiple of 128 -> full-width lane tile path.
    x3 = jax.random.normal(k3, (2, 37, 100), dtype=jnp.float32)
    out3 = jax.block_until_ready(min_over_dim1(x3))
    ref3 = jnp.min(x3, axis=1)
    assert jnp.allclose(out3, ref3), "case 3 mismatch vs reference"

    # Case 4: forced D2 split (lane-parallel axis) plus ragged reduction tail.
    x4 = jax.random.normal(k4, (4, 300, 512), dtype=jnp.float32)
    out4 = jax.block_until_ready(min_over_dim1(x4, max_block_bytes=32 * 1024))
    ref4 = jnp.min(x4, axis=1)
    assert jnp.allclose(out4, ref4), "case 4 mismatch vs reference"

    print("KERNEL_OK")
</pallas_src>

<mosaic_0001>
module attributes {stable_mosaic.version = 11 : i64} {
  func.func @_min_kernel(%arg0: i32, %arg1: i32, %arg2: i32, %arg3: memref<2x20x128xf32, #tpu.memory_space<vmem>>, %arg4: memref<2x128xf32, #tpu.memory_space<vmem>>) attributes {dimension_semantics = [#tpu.dimension_semantics<parallel>, #tpu.dimension_semantics<parallel>, #tpu.dimension_semantics<arbitrary>], iteration_bounds = array<i64: 1, 1, 1>, scalar_prefetch = 0 : i64, scratch_operands = 0 : i64, tpu.core_type = #tpu.core_type<tc>, window_params = [{transform_indices = @transform_0, window_bounds = array<i64: 2, 20, 128>}, {transform_indices = @transform_1, window_bounds = array<i64: 2, 128>}]} {
    %c0 = arith.constant 0 : index
    %c0_0 = arith.constant 0 : index
    %c0_1 = arith.constant 0 : index
    %0 = vector.load %arg3[%c0, %c0_0, %c0_1] : memref<2x20x128xf32, #tpu.memory_space<vmem>>, vector<2x20x128xf32>
    %cst = arith.constant dense<0x7F800000> : vector<2x128xf32>
    %1 = vector.multi_reduction <minimumf>, %0, %cst [1] : vector<2x20x128xf32> to vector<2x128xf32>
    %c0_i32 = arith.constant 0 : i32
    %2 = arith.cmpi eq, %arg2, %c0_i32 : i32
    %3 = arith.extui %2 : i1 to i32
    %c0_i32_2 = arith.constant 0 : i32
    %4 = arith.cmpi ne, %3, %c0_i32_2 : i32
    scf.if %4 {
      %c0_5 = arith.constant 0 : index
      %c0_6 = arith.constant 0 : index
      %8 = vector.load %arg4[%c0_5, %c0_6] : memref<2x128xf32, #tpu.memory_space<vmem>>, vector<2x128xf32>
      tpu.vector_store %arg4[%c0_5, %c0_6], %1 {strides = array<i32>} : memref<2x128xf32, #tpu.memory_space<vmem>>, vector<2x128xf32>,
    } else {
    }
    %c0_i32_3 = arith.constant 0 : i32
    %5 = arith.cmpi ne, %arg2, %c0_i32_3 : i32
    %6 = arith.extui %5 : i1 to i32
    %c0_i32_4 = arith.constant 0 : i32
    %7 = arith.cmpi ne, %6, %c0_i32_4 : i32
    scf.if %7 {
      %c0_5 = arith.constant 0 : index
      %c0_6 = arith.constant 0 : index
      %8 = vector.load %arg4[%c0_5, %c0_6] : memref<2x128xf32, #tpu.memory_space<vmem>>, vector<2x128xf32>
      %9 = arith.minimumf %8, %1 : vector<2x128xf32>
      %c0_7 = arith.constant 0 : index
      %c0_8 = arith.constant 0 : index
      %10 = vector.load %arg4[%c0_7, %c0_8] : memref<2x128xf32, #tpu.memory_space<vmem>>, vector<2x128xf32>
      tpu.vector_store %arg4[%c0_7, %c0_8], %9 {strides = array<i32>} : memref<2x128xf32, #tpu.memory_space<vmem>>, vector<2x128xf32>,
    } else {
    }
    return
  }
  func.func @transform_0(%arg0: i32, %arg1: i32, %arg2: i32) -> (i32, i32, i32) {
    %c0_i32 = arith.constant 0 : i32
    return %arg0, %arg2, %arg1 : i32, i32, i32
  }
  func.func @transform_1(%arg0: i32, %arg1: i32, %arg2: i32) -> (i32, i32) {
    %c0_i32 = arith.constant 0 : i32
    return %arg0, %arg1 : i32, i32
  }
}

</mosaic_0001>

<bundles_post_ra>
// kernel: tpu_custom_call.1
= control target key start
LH: loop header
LB: loop body
LE: loop exit
PB: predicated region body
PF: predicated region fallthrough
CT: control target
= control target key end

     0   :  { %vm15_vm0 = vcmask 1043456   ;;  %s125_s0 = inlined_call_operand.vmem [shape: f32[2,20,128], index: 0, kind: input, shape index: {}]   ;;  %s126_s1 = inlined_call_operand.hbm [shape: f32[2,128], index: 1, kind: output, shape index: {}]  }
   0x1   :  { %v9_v0 = vld [vmem:[%s125_s0] sm:$0xff]  ;;  %v11_v1 = vld [vmem:[%s125_s0 + $0x10] sm:$0xf]  ;;  %v10_v2 = vld [vmem:[%s125_s0 + $0x8] sm:$0xff] }
   0x2   :  { %v12_v3 = vld [vmem:[%s125_s0 + $0x18] sm:$0xff]  ;;  %v14_v4 = vld [vmem:[%s125_s0 + $0x28] sm:$0xf]  ;;  %v16_v5 = vsel %vm15_vm0, %v11_v1, inf  ;;  %v13_v6 = vld [vmem:[%s125_s0 + $0x20] sm:$0xff] }
   0x3   :  { %v17_v7 = vmin.f32 %v9_v0, %v16_v5  ;;  %v25_v8 = vsel %vm15_vm0, %v14_v4, inf }
   0x4   :  { %6 = vsyncpa [#allocation3], 0  ;;  %v26_v9 = vmin.f32 %v12_v3, %v25_v8  ;;  %s93_s18 = smov [#allocation2]   ;;  %vm40_vm1 = vcmask 1041409  }
   0x5   :  { %v18_v10 = vmin.f32 %v17_v7, %v10_v2  ;;  %s62_s19 = sshll.u32 %s93_s18, 4  ;;  %s63_s19 = int_to_ptr.vmem [resolvable:$true] %s62_s19 }
   0x6   :  { %v27_v11 = vmin.f32 %v26_v9, %v13_v6  ;;  %s71_s0 = scalar_lea.vmem %s63_s19, 32  ;;  %p76_p1 = scmp.lt.s32.totalorder %s63_s19, %s63_s19 }
   0x7   :  { %v19_v12 = vrot.slane %v18_v10, 4  ;;  %p72_p0 = scmp.ne.s32.totalorder %s63_s19, %s71_s0  ;;  %p77_p2 = scmp.lt.s32.totalorder %s71_s0, %s71_s0 }
   0x8   :  { %v28_v13 = vrot.slane %v27_v11, 4 }
   0x9   :  { %v20_v14 = vmin.f32 %v18_v10, %v19_v12  ;;  %p78_p3 = por %p77_p2, %p76_p1 }
   0xa   :  { %v29_v15 = vmin.f32 %v27_v11, %v28_v13 }
   0xb   :  { %v21_v16 = vrot.slane %v20_v14, 2  ;;  %p79_p4 = pnand %p78_p3, %p72_p0 }
   0xc   :  { %v30_v17 = vrot.slane %v29_v15, 2 }
   0xd   :  { %v22_v18 = vmin.f32 %v20_v14, %v21_v16 }
   0xe   :  { %v31_v19 = vmin.f32 %v29_v15, %v30_v17 }
   0xf   :  { %v23_v20 = vrot.slane %v22_v18, 1 }
  0x10   :  { %v32_v21 = vrot.slane %v31_v19, 1 }
  0x11   :  { %v24_v22 = vmin.f32 %v22_v18, %v23_v20 }
  0x12   :  { %v33_v23 = vmin.f32 %v31_v19, %v32_v21 }
  0x14   :  { %v41_v24 = vsel %vm40_vm1, %v33_v23, %v24_v22 }
  0x15   :  { %43 = vst [vmem:[#allocation2] sm:$0x3] %v41_v24 }
  0x16   :  { %82 = shalt.err (!%p79_p4)
}
  0x17   :  { %65 = dma.vmem_to_hbm [thread:$0]  %s63_s19, 32, %s126_s1, [#allocation3]  }
  0x18   :  { %91 = dma.done.wait [#allocation3], 32  }
  0x19   :  { %92 = vsyncadd [#allocation3], 4294967264 }
  0x1a   :  { %69 = vsyncpa [#allocation3], 1 }

</bundles_post_ra>
